<compile_context>
chip_gen: v7x
topology: tpu7x:2x2x1
jax: 0.10.0
libtpu: 0.0.40
codegen_flags: <defaults>
</compile_context>

<pallas_src>
import jax
import jax.numpy as jnp
from jax.experimental import pallas as pl
from jax.experimental.pallas import tpu as pltpu


def _round_up(x, m):
    return ((x + m - 1) // m) * m


def _spectral_mul_kernel(xr_ref, xi_ref, wr_ref, wi_ref, yr_ref, yi_ref):
    """One frequency tile: y[b,o,f] = sum_i x[b,i,f] * w[i,o,f]  (complex).

    All slices below are static, so they are zero-cost ref views; every
    arithmetic op is elementwise along the lane (frequency) axis -> pure VPU
    FMAs, no masked stores, no MXU underfill.
    """
    cin = xr_ref.shape[1]

    a = xr_ref[:, 0:1, :]            # (B, 1, TF)
    b = xi_ref[:, 0:1, :]
    c = wr_ref[0:1, :, :]            # (1, Cout, TF)
    d = wi_ref[0:1, :, :]
    yr = a * c - b * d               # Re: ac - bd
    yi = a * d + b * c               # Im: ad + bc
    for i in range(1, cin):          # tiny, static -> fully unrolled
        a = xr_ref[:, i:i + 1, :]
        b = xi_ref[:, i:i + 1, :]
        c = wr_ref[i:i + 1, :, :]
        d = wi_ref[i:i + 1, :, :]
        yr = yr + (a * c - b * d)
        yi = yi + (a * d + b * c)
    yr_ref[...] = yr
    yi_ref[...] = yi


def _pick_tile_f(f_hint, b, cin, cout, vmem_budget_bytes=20 * 1024 * 1024):
    """Largest lane-aligned frequency tile whose double-buffered working set
    (xr/xi + wr/wi + yr/yi, all f32) fits a VMEM budget safe on v5e/v6e/v7x."""
    bytes_per_lane = 2 * 2 * 4 * (b * cin + cin * cout + b * cout)
    #                ^   ^   ^-- f32 bytes
    #                |   +------ real + imag
    #                +---------- double buffering
    t = (vmem_budget_bytes // bytes_per_lane) // 128 * 128
    return max(128, min(t, 2048, f_hint))


def spectral_complex_mul(xr, xi, wr, wi, *, tile_f):
    """Per-frequency complex channel mix.

    xr/xi : (B, Cin, F) f32, wr/wi : (Cin, Cout, F) f32, F a multiple of
    tile_f (itself a multiple of 128).  Returns yr, yi : (B, Cout, F) f32.
    """
    B, Cin, F = xr.shape
    Cout = wr.shape[1]
    assert F % tile_f == 0 and tile_f % 128 == 0

    out_sd = jax.ShapeDtypeStruct((B, Cout, F), jnp.float32)
    spec_x = pl.BlockSpec((B, Cin, tile_f), lambda f: (0, 0, f))
    spec_w = pl.BlockSpec((Cin, Cout, tile_f), lambda f: (0, 0, f))
    spec_y = pl.BlockSpec((B, Cout, tile_f), lambda f: (0, 0, f))

    cost = pl.CostEstimate(
        flops=8 * B * Cin * Cout * F,
        transcendentals=0,
        bytes_accessed=4 * 2 * F * (B * Cin + Cin * Cout + B * Cout),
    )

    yr, yi = pl.pallas_call(
        _spectral_mul_kernel,
        out_shape=(out_sd, out_sd),
        grid=(F // tile_f,),
        in_specs=[spec_x, spec_x, spec_w, spec_w],
        out_specs=(spec_y, spec_y),
        compiler_params=pltpu.CompilerParams(
            dimension_semantics=("parallel",),
            vmem_limit_bytes=32 * 1024 * 1024,
        ),
        cost_estimate=cost,
    )(xr, xi, wr, wi)
    return yr, yi


def spectral_conv1d(x, w_real, w_imag, modes1):
    """x: (B, Cin, N); w_real/w_imag: (Cin, Cout, modes1). Returns (B, Cout, N)."""
    x = x.astype(jnp.float32)
    B, Cin, N = x.shape
    Cout = w_real.shape[1]
    n_freq = N // 2 + 1
    assert modes1 <= n_freq, "modes1 must not exceed N//2 + 1"

    # TODO(synk): no Pallas FFT primitive; rfft/irfft run in plain JAX (XLA).
    x_ft = jnp.fft.rfft(x, axis=-1)                       # (B, Cin, n_freq) c64

    # Only the first `modes1` frequencies contribute; the kernel works on a
    # lane-aligned pad of exactly that region.
    tile_f = _pick_tile_f(_round_up(modes1, 128), B, Cin, Cout)
    m_pad = _round_up(modes1, tile_f)

    x_modes = x_ft[:, :, :modes1]
    xr = jnp.pad(jnp.real(x_modes).astype(jnp.float32),
                 ((0, 0), (0, 0), (0, m_pad - modes1)))
    xi = jnp.pad(jnp.imag(x_modes).astype(jnp.float32),
                 ((0, 0), (0, 0), (0, m_pad - modes1)))
    wr = jnp.pad(w_real.astype(jnp.float32),
                 ((0, 0), (0, 0), (0, m_pad - modes1)))
    wi = jnp.pad(w_imag.astype(jnp.float32),
                 ((0, 0), (0, 0), (0, m_pad - modes1)))

    yr, yi = spectral_complex_mul(xr, xi, wr, wi, tile_f=tile_f)  # (B,Cout,m_pad)

    # out_ft: first modes1 frequencies from the kernel, the rest exactly zero
    # (this is torch's zeros(out_ft) + slice-assign).
    out_modes = jax.lax.complex(yr[:, :, :modes1], yi[:, :, :modes1])
    out_ft = jnp.pad(out_modes, ((0, 0), (0, 0), (0, n_freq - modes1)))
    return jnp.fft.irfft(out_ft, n=N, axis=-1).astype(jnp.float32)


if __name__ == "__main__":
    # Module hyper-params (small, consistent with SpectralConv1d.__init__).
    B, C_IN, C_OUT, N, MODES1 = 2, 4, 4, 16, 8

    key = jax.random.PRNGKey(0)
    kx, kwr, kwi = jax.random.split(key, 3)

    # Input in PyTorch NCW layout: (batch, in_channels, width).
    x = jax.random.normal(kx, (B, C_IN, N), dtype=jnp.float32)

    # weights_1d = scale * torch.rand(Cin, Cout, modes1, dtype=cfloat)
    scale = 1.0 / (C_IN * C_OUT)
    w_real = scale * jax.random.uniform(kwr, (C_IN, C_OUT, MODES1), dtype=jnp.float32)
    w_imag = scale * jax.random.uniform(kwi, (C_IN, C_OUT, MODES1), dtype=jnp.float32)

    y = spectral_conv1d(x, w_real, w_imag, MODES1)
    y = jax.block_until_ready(y)
    assert y.shape == (B, C_OUT, N) and y.dtype == jnp.float32

    # Pure-JAX reference of the full forward pass (complex einsum done in jnp).
    x_ft = jnp.fft.rfft(x, axis=-1)
    w_c = w_real + 1j * w_imag
    out_modes = jnp.einsum('bix,iox->box', x_ft[:, :, :MODES1], w_c)
    out_ft = jnp.pad(out_modes, ((0, 0), (0, 0), (0, N // 2 + 1 - MODES1)))
    y_ref = jnp.fft.irfft(out_ft, n=N, axis=-1)

    assert jnp.allclose(y, y_ref, atol=1e-5, rtol=1e-5), "mismatch vs reference"
    print("KERNEL_OK")
</pallas_src>

<mosaic_0001>
module attributes {stable_mosaic.version = 11 : i64} {
  func.func @_spectral_mul_kernel(%arg0: i32, %arg1: memref<2x4x128xf32, #tpu.memory_space<vmem>>, %arg2: memref<2x4x128xf32, #tpu.memory_space<vmem>>, %arg3: memref<4x4x128xf32, #tpu.memory_space<vmem>>, %arg4: memref<4x4x128xf32, #tpu.memory_space<vmem>>, %arg5: memref<2x4x128xf32, #tpu.memory_space<vmem>>, %arg6: memref<2x4x128xf32, #tpu.memory_space<vmem>>) attributes {dimension_semantics = [#tpu.dimension_semantics<parallel>], iteration_bounds = array<i64: 1>, scalar_prefetch = 0 : i64, scratch_operands = 0 : i64, tpu.core_type = #tpu.core_type<tc>, window_params = [{transform_indices = @transform_0, window_bounds = array<i64: 2, 4, 128>}, {transform_indices = @transform_1, window_bounds = array<i64: 2, 4, 128>}, {transform_indices = @transform_2, window_bounds = array<i64: 4, 4, 128>}, {transform_indices = @transform_3, window_bounds = array<i64: 4, 4, 128>}, {transform_indices = @transform_4, window_bounds = array<i64: 2, 4, 128>}, {transform_indices = @transform_5, window_bounds = array<i64: 2, 4, 128>}]} {
    %c0 = arith.constant 0 : index
    %c0_0 = arith.constant 0 : index
    %c0_1 = arith.constant 0 : index
    %0 = vector.load %arg1[%c0, %c0_0, %c0_1] : memref<2x4x128xf32, #tpu.memory_space<vmem>>, vector<2x1x128xf32>
    %c0_2 = arith.constant 0 : index
    %c0_3 = arith.constant 0 : index
    %c0_4 = arith.constant 0 : index
    %1 = vector.load %arg2[%c0_2, %c0_3, %c0_4] : memref<2x4x128xf32, #tpu.memory_space<vmem>>, vector<2x1x128xf32>
    %c0_5 = arith.constant 0 : index
    %c0_6 = arith.constant 0 : index
    %c0_7 = arith.constant 0 : index
    %2 = vector.load %arg3[%c0_5, %c0_6, %c0_7] : memref<4x4x128xf32, #tpu.memory_space<vmem>>, vector<1x4x128xf32>
    %c0_8 = arith.constant 0 : index
    %c0_9 = arith.constant 0 : index
    %c0_10 = arith.constant 0 : index
    %3 = vector.load %arg4[%c0_8, %c0_9, %c0_10] : memref<4x4x128xf32, #tpu.memory_space<vmem>>, vector<1x4x128xf32>
    %4 = vector.broadcast %0 : vector<2x1x128xf32> to vector<2x4x128xf32>
    %5 = vector.broadcast %2 : vector<1x4x128xf32> to vector<2x4x128xf32>
    %6 = arith.mulf %4, %5 : vector<2x4x128xf32>
    %7 = vector.broadcast %1 : vector<2x1x128xf32> to vector<2x4x128xf32>
    %8 = vector.broadcast %3 : vector<1x4x128xf32> to vector<2x4x128xf32>
    %9 = arith.mulf %7, %8 : vector<2x4x128xf32>
    %10 = arith.subf %6, %9 : vector<2x4x128xf32>
    %11 = vector.broadcast %0 : vector<2x1x128xf32> to vector<2x4x128xf32>
    %12 = vector.broadcast %3 : vector<1x4x128xf32> to vector<2x4x128xf32>
    %13 = arith.mulf %11, %12 : vector<2x4x128xf32>
    %14 = vector.broadcast %1 : vector<2x1x128xf32> to vector<2x4x128xf32>
    %15 = vector.broadcast %2 : vector<1x4x128xf32> to vector<2x4x128xf32>
    %16 = arith.mulf %14, %15 : vector<2x4x128xf32>
    %17 = arith.addf %13, %16 : vector<2x4x128xf32>
    %c0_11 = arith.constant 0 : index
    %c1 = arith.constant 1 : index
    %c0_12 = arith.constant 0 : index
    %18 = vector.load %arg1[%c0_11, %c1, %c0_12] : memref<2x4x128xf32, #tpu.memory_space<vmem>>, vector<2x1x128xf32>
    %c0_13 = arith.constant 0 : index
    %c1_14 = arith.constant 1 : index
    %c0_15 = arith.constant 0 : index
    %19 = vector.load %arg2[%c0_13, %c1_14, %c0_15] : memref<2x4x128xf32, #tpu.memory_space<vmem>>, vector<2x1x128xf32>
    %c1_16 = arith.constant 1 : index
    %c0_17 = arith.constant 0 : index
    %c0_18 = arith.constant 0 : index
    %20 = vector.load %arg3[%c1_16, %c0_17, %c0_18] : memref<4x4x128xf32, #tpu.memory_space<vmem>>, vector<1x4x128xf32>
    %c1_19 = arith.constant 1 : index
    %c0_20 = arith.constant 0 : index
    %c0_21 = arith.constant 0 : index
    %21 = vector.load %arg4[%c1_19, %c0_20, %c0_21] : memref<4x4x128xf32, #tpu.memory_space<vmem>>, vector<1x4x128xf32>
    %22 = vector.broadcast %18 : vector<2x1x128xf32> to vector<2x4x128xf32>
    %23 = vector.broadcast %20 : vector<1x4x128xf32> to vector<2x4x128xf32>
    %24 = arith.mulf %22, %23 : vector<2x4x128xf32>
    %25 = vector.broadcast %19 : vector<2x1x128xf32> to vector<2x4x128xf32>
    %26 = vector.broadcast %21 : vector<1x4x128xf32> to vector<2x4x128xf32>
    %27 = arith.mulf %25, %26 : vector<2x4x128xf32>
    %28 = arith.subf %24, %27 : vector<2x4x128xf32>
    %29 = arith.addf %10, %28 : vector<2x4x128xf32>
    %30 = vector.broadcast %18 : vector<2x1x128xf32> to vector<2x4x128xf32>
    %31 = vector.broadcast %21 : vector<1x4x128xf32> to vector<2x4x128xf32>
    %32 = arith.mulf %30, %31 : vector<2x4x128xf32>
    %33 = vector.broadcast %19 : vector<2x1x128xf32> to vector<2x4x128xf32>
    %34 = vector.broadcast %20 : vector<1x4x128xf32> to vector<2x4x128xf32>
    %35 = arith.mulf %33, %34 : vector<2x4x128xf32>
    %36 = arith.addf %32, %35 : vector<2x4x128xf32>
    %37 = arith.addf %17, %36 : vector<2x4x128xf32>
    %c0_22 = arith.constant 0 : index
    %c2 = arith.constant 2 : index
    %c0_23 = arith.constant 0 : index
    %38 = vector.load %arg1[%c0_22, %c2, %c0_23] : memref<2x4x128xf32, #tpu.memory_space<vmem>>, vector<2x1x128xf32>
    %c0_24 = arith.constant 0 : index
    %c2_25 = arith.constant 2 : index
    %c0_26 = arith.constant 0 : index
    %39 = vector.load %arg2[%c0_24, %c2_25, %c0_26] : memref<2x4x128xf32, #tpu.memory_space<vmem>>, vector<2x1x128xf32>
    %c2_27 = arith.constant 2 : index
    %c0_28 = arith.constant 0 : index
    %c0_29 = arith.constant 0 : index
    %40 = vector.load %arg3[%c2_27, %c0_28, %c0_29] : memref<4x4x128xf32, #tpu.memory_space<vmem>>, vector<1x4x128xf32>
    %c2_30 = arith.constant 2 : index
    %c0_31 = arith.constant 0 : index
    %c0_32 = arith.constant 0 : index
    %41 = vector.load %arg4[%c2_30, %c0_31, %c0_32] : memref<4x4x128xf32, #tpu.memory_space<vmem>>, vector<1x4x128xf32>
    %42 = vector.broadcast %38 : vector<2x1x128xf32> to vector<2x4x128xf32>
    %43 = vector.broadcast %40 : vector<1x4x128xf32> to vector<2x4x128xf32>
    %44 = arith.mulf %42, %43 : vector<2x4x128xf32>
    %45 = vector.broadcast %39 : vector<2x1x128xf32> to vector<2x4x128xf32>
    %46 = vector.broadcast %41 : vector<1x4x128xf32> to vector<2x4x128xf32>
    %47 = arith.mulf %45, %46 : vector<2x4x128xf32>
    %48 = arith.subf %44, %47 : vector<2x4x128xf32>
    %49 = arith.addf %29, %48 : vector<2x4x128xf32>
    %50 = vector.broadcast %38 : vector<2x1x128xf32> to vector<2x4x128xf32>
    %51 = vector.broadcast %41 : vector<1x4x128xf32> to vector<2x4x128xf32>
    %52 = arith.mulf %50, %51 : vector<2x4x128xf32>
    %53 = vector.broadcast %39 : vector<2x1x128xf32> to vector<2x4x128xf32>
    %54 = vector.broadcast %40 : vector<1x4x128xf32> to vector<2x4x128xf32>
    %55 = arith.mulf %53, %54 : vector<2x4x128xf32>
    %56 = arith.addf %52, %55 : vector<2x4x128xf32>
    %57 = arith.addf %37, %56 : vector<2x4x128xf32>
    %c0_33 = arith.constant 0 : index
    %c3 = arith.constant 3 : index
    %c0_34 = arith.constant 0 : index
    %58 = vector.load %arg1[%c0_33, %c3, %c0_34] : memref<2x4x128xf32, #tpu.memory_space<vmem>>, vector<2x1x128xf32>
    %c0_35 = arith.constant 0 : index
    %c3_36 = arith.constant 3 : index
    %c0_37 = arith.constant 0 : index
    %59 = vector.load %arg2[%c0_35, %c3_36, %c0_37] : memref<2x4x128xf32, #tpu.memory_space<vmem>>, vector<2x1x128xf32>
    %c3_38 = arith.constant 3 : index
    %c0_39 = arith.constant 0 : index
    %c0_40 = arith.constant 0 : index
    %60 = vector.load %arg3[%c3_38, %c0_39, %c0_40] : memref<4x4x128xf32, #tpu.memory_space<vmem>>, vector<1x4x128xf32>
    %c3_41 = arith.constant 3 : index
    %c0_42 = arith.constant 0 : index
    %c0_43 = arith.constant 0 : index
    %61 = vector.load %arg4[%c3_41, %c0_42, %c0_43] : memref<4x4x128xf32, #tpu.memory_space<vmem>>, vector<1x4x128xf32>
    %62 = vector.broadcast %58 : vector<2x1x128xf32> to vector<2x4x128xf32>
    %63 = vector.broadcast %60 : vector<1x4x128xf32> to vector<2x4x128xf32>
    %64 = arith.mulf %62, %63 : vector<2x4x128xf32>
    %65 = vector.broadcast %59 : vector<2x1x128xf32> to vector<2x4x128xf32>
    %66 = vector.broadcast %61 : vector<1x4x128xf32> to vector<2x4x128xf32>
    %67 = arith.mulf %65, %66 : vector<2x4x128xf32>
    %68 = arith.subf %64, %67 : vector<2x4x128xf32>
    %69 = arith.addf %49, %68 : vector<2x4x128xf32>
    %70 = vector.broadcast %58 : vector<2x1x128xf32> to vector<2x4x128xf32>
    %71 = vector.broadcast %61 : vector<1x4x128xf32> to vector<2x4x128xf32>
    %72 = arith.mulf %70, %71 : vector<2x4x128xf32>
    %73 = vector.broadcast %59 : vector<2x1x128xf32> to vector<2x4x128xf32>
    %74 = vector.broadcast %60 : vector<1x4x128xf32> to vector<2x4x128xf32>
    %75 = arith.mulf %73, %74 : vector<2x4x128xf32>
    %76 = arith.addf %72, %75 : vector<2x4x128xf32>
    %77 = arith.addf %57, %76 : vector<2x4x128xf32>
    %c0_44 = arith.constant 0 : index
    %c0_45 = arith.constant 0 : index
    %c0_46 = arith.constant 0 : index
    %78 = vector.load %arg5[%c0_44, %c0_45, %c0_46] : memref<2x4x128xf32, #tpu.memory_space<vmem>>, vector<2x4x128xf32>
    tpu.vector_store %arg5[%c0_44, %c0_45, %c0_46], %69 {strides = array<i32>} : memref<2x4x128xf32, #tpu.memory_space<vmem>>, vector<2x4x128xf32>,
    %c0_47 = arith.constant 0 : index
    %c0_48 = arith.constant 0 : index
    %c0_49 = arith.constant 0 : index
    %79 = vector.load %arg6[%c0_47, %c0_48, %c0_49] : memref<2x4x128xf32, #tpu.memory_space<vmem>>, vector<2x4x128xf32>
    tpu.vector_store %arg6[%c0_47, %c0_48, %c0_49], %77 {strides = array<i32>} : memref<2x4x128xf32, #tpu.memory_space<vmem>>, vector<2x4x128xf32>,
    return
  }
  func.func @transform_0(%arg0: i32) -> (i32, i32, i32) {
    %c0_i32 = arith.constant 0 : i32
    %c0_i32_0 = arith.constant 0 : i32
    %c0_i32_1 = arith.constant 0 : i32
    return %c0_i32, %c0_i32_0, %arg0 : i32, i32, i32
  }
  func.func @transform_1(%arg0: i32) -> (i32, i32, i32) {
    %c0_i32 = arith.constant 0 : i32
    %c0_i32_0 = arith.constant 0 : i32
    %c0_i32_1 = arith.constant 0 : i32
    return %c0_i32, %c0_i32_0, %arg0 : i32, i32, i32
  }
  func.func @transform_2(%arg0: i32) -> (i32, i32, i32) {
    %c0_i32 = arith.constant 0 : i32
    %c0_i32_0 = arith.constant 0 : i32
    %c0_i32_1 = arith.constant 0 : i32
    return %c0_i32, %c0_i32_0, %arg0 : i32, i32, i32
  }
  func.func @transform_3(%arg0: i32) -> (i32, i32, i32) {
    %c0_i32 = arith.constant 0 : i32
    %c0_i32_0 = arith.constant 0 : i32
    %c0_i32_1 = arith.constant 0 : i32
    return %c0_i32, %c0_i32_0, %arg0 : i32, i32, i32
  }
  func.func @transform_4(%arg0: i32) -> (i32, i32, i32) {
    %c0_i32 = arith.constant 0 : i32
    %c0_i32_0 = arith.constant 0 : i32
    %c0_i32_1 = arith.constant 0 : i32
    return %c0_i32, %c0_i32_0, %arg0 : i32, i32, i32
  }
  func.func @transform_5(%arg0: i32) -> (i32, i32, i32) {
    %c0_i32 = arith.constant 0 : i32
    %c0_i32_0 = arith.constant 0 : i32
    %c0_i32_1 = arith.constant 0 : i32
    return %c0_i32, %c0_i32_0, %arg0 : i32, i32, i32
  }
}

</mosaic_0001>

<bundles_post_ra>
// kernel: tpu_custom_call.1
= control target key start
LH: loop header
LB: loop body
LE: loop exit
PB: predicated region body
PF: predicated region fallthrough
CT: control target
= control target key end

     0   :  { %11 = vsyncpa [#allocation3], 0  ;;  %s589_s0 = inlined_call_operand.hbm [shape: f32[2,4,128], index: 0, kind: input, shape index: {}]   ;;  %s590_s1 = inlined_call_operand.hbm [shape: f32[2,4,128], index: 1, kind: input, shape index: {}]   ;;  %s591_s2 = inlined_call_operand.hbm [shape: f32[4,4,128], index: 2, kind: input, shape index: {}]   ;;  %s592_s3 = inlined_call_operand.hbm [shape: f32[4,4,128], index: 3, kind: input, shape index: {}]   ;;  %s593_s4 = inlined_call_operand.hbm [shape: f32[2,4,128], index: 4, kind: output, shape index: {0}]   ;;  %s594_s5 = inlined_call_operand.hbm [shape: f32[2,4,128], index: 5, kind: output, shape index: {1}]  }
   0x1   :  { %12 = vsyncpa [#allocation6], 0 }
   0x2   :  { %13 = vsyncpa [#allocation9], 0 }
   0x3   :  { %14 = vsyncpa [#allocation4], 0 }
   0x4   :  { %15 = vsyncpa [#allocation12], 0  ;;  %s435_s18 = smov [#allocation5]   ;;  %s436_s20 = smov [#allocation2]  }
   0x5   :  { %s33_s19 = sshll.u32 %s435_s18, 4  ;;  %s21_s21 = sshll.u32 %s436_s20, 4  ;;  %s34_s19 = int_to_ptr.vmem [resolvable:$true] %s33_s19  ;;  %s473_s21 = int_to_ptr.vmem [resolvable:$true] %s21_s21 }
   0x6   :  { %s293_s24 = scalar_lea.hbm %s590_s1, 128 }
   0x7   :  { %p294_p0 = scmp.ne.s32.totalorder %s590_s1, %s293_s24  ;;  %p297_p1 = scmp.lt.u32.totalorder %s293_s24, %s590_s1 }
   0x9   :  { %p299_p2 = pnand %p297_p1, %p294_p0 }
   0xb   :  { %302 = shalt.err (!%p299_p2)
}
   0xc   :  { %s303_s29 = scalar_lea.vmem %s34_s19, 128  ;;  %p308_p4 = scmp.lt.s32.totalorder %s34_s19, %s34_s19 }
   0xd   :  { %p304_p3 = scmp.ne.s32.totalorder %s34_s19, %s303_s29  ;;  %p309_p5 = scmp.lt.s32.totalorder %s303_s29, %s303_s29 }
   0xf   :  { %p310_p6 = por %p309_p5, %p308_p4 }
  0x11   :  { %p311_p7 = pnand %p310_p6, %p304_p3 }
  0x13   :  { %314 = shalt.err (!%p311_p7)
}
  0x14   :  { %s437_s30 = smov 64   ;;  %s438_s6 = smov 4  }
  0x15   :  { %39 = dma.hbm_to_vmem [thread:$0]  %s590_s1, 128, %s34_s19, [#allocation6], %s437_s30, %s437_s30, %s438_s6  }
  0x16   :  { %s315_s11 = scalar_lea.hbm %s589_s0, 128 }
  0x17   :  { %p316_p8 = scmp.ne.s32.totalorder %s589_s0, %s315_s11  ;;  %p319_p9 = scmp.lt.u32.totalorder %s315_s11, %s589_s0 }
  0x19   :  { %p321_p10 = pnand %p319_p9, %p316_p8 }
  0x1b   :  { %324 = shalt.err (!%p321_p10)
}
  0x1c   :  { %s325_s16 = scalar_lea.vmem %s473_s21, 128  ;;  %p330_p12 = scmp.lt.s32.totalorder %s473_s21, %s473_s21 }
  0x1d   :  { %p326_p11 = scmp.ne.s32.totalorder %s473_s21, %s325_s16  ;;  %p331_p13 = scmp.lt.s32.totalorder %s325_s16, %s325_s16 }
  0x1f   :  { %p332_p0 = por %p331_p13, %p330_p12 }
  0x21   :  { %p333_p1 = pnand %p332_p0, %p326_p11 }
  0x23   :  { %336 = shalt.err (!%p333_p1)
}
  0x24   :  { %27 = dma.hbm_to_vmem [thread:$0]  %s589_s0, 128, %s473_s21, [#allocation3], %s437_s30, %s437_s30, %s438_s6  }
  0x25   :  { %s439_s18 = smov [#allocation7]   ;;  %s440_s20 = smov [#allocation8]  }
  0x26   :  { %s45_s19 = sshll.u32 %s439_s18, 4  ;;  %s57_s22 = sshll.u32 %s440_s20, 4  ;;  %s46_s19 = int_to_ptr.vmem [resolvable:$true] %s45_s19  ;;  %s510_s22 = int_to_ptr.vmem [resolvable:$true] %s57_s22 }
  0x27   :  { %s337_s25 = scalar_lea.hbm %s591_s2, 256 }
  0x28   :  { %p338_p2 = scmp.ne.s32.totalorder %s591_s2, %s337_s25  ;;  %p341_p3 = scmp.lt.u32.totalorder %s337_s25, %s591_s2 }
  0x2a   :  { %p343_p4 = pnand %p341_p3, %p338_p2 }
  0x2c   :  { %346 = shalt.err (!%p343_p4)
}
  0x2d   :  { %s347_s0 = scalar_lea.vmem %s46_s19, 256  ;;  %p352_p6 = scmp.lt.s32.totalorder %s46_s19, %s46_s19 }
  0x2e   :  { %p348_p5 = scmp.ne.s32.totalorder %s46_s19, %s347_s0  ;;  %p353_p7 = scmp.lt.s32.totalorder %s347_s0, %s347_s0 }
  0x30   :  { %p354_p8 = por %p353_p7, %p352_p6 }
  0x32   :  { %p355_p9 = pnand %p354_p8, %p348_p5 }
  0x34   :  { %358 = shalt.err (!%p355_p9)
}
  0x35   :  { %51 = dma.hbm_to_vmem [thread:$0]  %s591_s2, 256, %s46_s19, [#allocation6], %s437_s30, %s437_s30, %s438_s6  }
  0x36   :  { %s359_s10 = scalar_lea.hbm %s592_s3, 256 }
  0x37   :  { %p360_p10 = scmp.ne.s32.totalorder %s592_s3, %s359_s10  ;;  %p363_p11 = scmp.lt.u32.totalorder %s359_s10, %s592_s3 }
  0x39   :  { %p365_p12 = pnand %p363_p11, %p360_p10 }
  0x3b   :  { %368 = shalt.err (!%p365_p12)
}
  0x3c   :  { %s369_s15 = scalar_lea.vmem %s510_s22, 256  ;;  %p374_p0 = scmp.lt.s32.totalorder %s510_s22, %s510_s22 }
  0x3d   :  { %p370_p13 = scmp.ne.s32.totalorder %s510_s22, %s369_s15  ;;  %p375_p1 = scmp.lt.s32.totalorder %s369_s15, %s369_s15 }
  0x3f   :  { %p376_p2 = por %p375_p1, %p374_p0 }
  0x41   :  { %p377_p3 = pnand %p376_p2, %p370_p13 }
  0x43   :  { %380 = shalt.err (!%p377_p3)
}
  0x44   :  { %63 = dma.hbm_to_vmem [thread:$0]  %s592_s3, 256, %s510_s22, [#allocation9], %s437_s30, %s437_s30, %s438_s6  }
  0x45   :  { %425 = dma.done.wait [#allocation3], 128  }
  0x46   :  { %426 = vsyncadd [#allocation3], 4294967168 }
  0x47   :  { %427 = dma.done.wait [#allocation6], 384  }
  0x48   :  { %428 = vsyncadd [#allocation6], 4294966912 }
  0x49   :  { %429 = dma.done.wait [#allocation9], 256  }
  0x4a   :  { %430 = vsyncadd [#allocation9], 4294967040  ;;  %v269_v0 = vld [vmem:[#allocation2] ss:$0 sm:$0xff]  ;;  %v271_v1 = vld [vmem:[#allocation5] ss:$0 sm:$0xff] }
  0x4b   :  { %v547_v2 = vld [vmem:[#allocation7] sm:$0xf]  ;;  %v81_v3 = vld [vmem:[#allocation8] sm:$0xf]  ;;  %v275_v6 = vld [vmem:[#allocation5 + $0x1] ss:$0 sm:$0xff] }
  0x4c   :  { %v90_v4 = vmul.f32 %v269_v0, %v547_v2  ;;  %v273_v5 = vld [vmem:[#allocation2 + $0x1] ss:$0 sm:$0xff]  ;;  %v106_v7 = vmul.f32 %v271_v1, %v547_v2  ;;  %v100_v8 = vmul.f32 %v271_v1, %v81_v3  ;;  %v551_v9 = vld [vmem:[#allocation7 + $0x4] sm:$0xf]  ;;  %v117_v10 = vld [vmem:[#allocation8 + $0x4] sm:$0xf]  ;;  %v104_v12 = vmul.f32 %v269_v0, %v81_v3 }
  0x4d   :  { %v277_v11 = vld [vmem:[#allocation2 + $0x2] ss:$0 sm:$0xff]  ;;  %v126_v13 = vmul.f32 %v273_v5, %v551_v9  ;;  %v136_v14 = vmul.f32 %v275_v6, %v117_v10  ;;  %v279_v15 = vld [vmem:[#allocation5 + $0x2] ss:$0 sm:$0xff]  ;;  %v155_v16 = vld [vmem:[#allocation7 + $0x8] sm:$0xf]  ;;  %v142_v18 = vmul.f32 %v273_v5, %v117_v10  ;;  %v144_v19 = vmul.f32 %v275_v6, %v551_v9 }
  0x4e   :  { %v157_v17 = vld [vmem:[#allocation8 + $0x8] sm:$0xf]  ;;  %v102_v20 = vsub.f32 %v90_v4, %v100_v8  ;;  %v166_v21 = vmul.f32 %v277_v11, %v155_v16  ;;  %v281_v23 = vld [vmem:[#allocation2 + $0x3] ss:$0 sm:$0xff]  ;;  %v195_v25 = vld [vmem:[#allocation7 + $0xc] sm:$0xf]  ;;  %v108_v26 = vadd.f32 %v106_v7, %v104_v12  ;;  %v184_v57 = vmul.f32 %v279_v15, %v155_v16 }
  0x4f   :  { %v176_v22 = vmul.f32 %v279_v15, %v157_v17  ;;  %v283_v24 = vld [vmem:[#allocation5 + $0x3] ss:$0 sm:$0xff]  ;;  %v138_v27 = vsub.f32 %v126_v13, %v136_v14  ;;  %v197_v28 = vld [vmem:[#allocation8 + $0xc] sm:$0xf]  ;;  %v206_v29 = vmul.f32 %v281_v23, %v195_v25  ;;  %v270_v30 = vld [vmem:[#allocation2 + $0x4] ss:$0 sm:$0xff]  ;;  %v146_v32 = vadd.f32 %v144_v19, %v142_v18 }
  0x50   :  { %v272_v31 = vld [vmem:[#allocation5 + $0x4] ss:$0 sm:$0xff]  ;;  %v182_v33 = vmul.f32 %v277_v11, %v157_v17  ;;  %v216_v35 = vmul.f32 %v283_v24, %v197_v28  ;;  %v91_v36 = vmul.f32 %v270_v30, %v547_v2  ;;  %v274_v38 = vld [vmem:[#allocation2 + $0x5] ss:$0 sm:$0xff]  ;;  %v276_v39 = vld [vmem:[#allocation5 + $0x5] ss:$0 sm:$0xff]  ;;  %v222_v58 = vmul.f32 %v281_v23, %v197_v28 }
  0x51   :  { %v178_v34 = vsub.f32 %v166_v21, %v176_v22  ;;  %v101_v37 = vmul.f32 %v272_v31, %v81_v3  ;;  %v278_v40 = vld [vmem:[#allocation2 + $0x6] ss:$0 sm:$0xff]  ;;  %v140_v41 = vadd.f32 %v138_v27, %v102_v20  ;;  %v127_v42 = vmul.f32 %v274_v38, %v551_v9  ;;  %v280_v44 = vld [vmem:[#allocation5 + $0x6] ss:$0 sm:$0xff]  ;;  %v282_v46 = vld [vmem:[#allocation2 + $0x7] ss:$0 sm:$0xff] }
  0x52   :  { %v137_v43 = vmul.f32 %v276_v39, %v117_v10  ;;  %v167_v45 = vmul.f32 %v278_v40, %v155_v16  ;;  %v284_v47 = vld [vmem:[#allocation5 + $0x7] ss:$0 sm:$0xff]  ;;  %v218_v48 = vsub.f32 %v206_v29, %v216_v35  ;;  %v177_v50 = vmul.f32 %v280_v44, %v157_v17  ;;  %s441_s3 = smov [#allocation10]   ;;  %s442_s17 = smov [#allocation11]  }
  0x53   :  { %v103_v49 = vsub.f32 %v91_v36, %v101_v37  ;;  %v207_v51 = vmul.f32 %v282_v46, %v195_v25  ;;  %v180_v52 = vadd.f32 %v178_v34, %v140_v41  ;;  %v217_v54 = vmul.f32 %v284_v47, %v197_v28  ;;  %s239_s1 = sshll.u32 %s441_s3, 4  ;;  %s251_s18 = sshll.u32 %s442_s17, 4  ;;  %s240_s1 = int_to_ptr.vmem [resolvable:$true] %s239_s1  ;;  %s252_s18 = int_to_ptr.vmem [resolvable:$true] %s251_s18 }
  0x54   :  { %v139_v53 = vsub.f32 %v127_v42, %v137_v43  ;;  %v148_v55 = vadd.f32 %v146_v32, %v108_v26  ;;  %v179_v56 = vsub.f32 %v167_v45, %v177_v50  ;;  %v224_v59 = vmul.f32 %v283_v24, %v195_v25  ;;  %s381_s19 = scalar_lea.vmem %s240_s1, 128  ;;  %p386_p5 = scmp.lt.s32.totalorder %s240_s1, %s240_s1 }
  0x55   :  { %v220_v60 = vadd.f32 %v218_v48, %v180_v52  ;;  %v219_v62 = vsub.f32 %v207_v51, %v217_v54  ;;  %v105_v63 = vmul.f32 %v270_v30, %v81_v3  ;;  %v186_v0 = vadd.f32 %v184_v57, %v182_v33  ;;  %p382_p4 = scmp.ne.s32.totalorder %s240_s1, %s381_s19  ;;  %p387_p6 = scmp.lt.s32.totalorder %s381_s19, %s381_s19 }
  0x56   :  { %v141_v61 = vadd.f32 %v139_v53, %v103_v49  ;;  %v226_v1 = vadd.f32 %v224_v59, %v222_v58  ;;  %v107_v4 = vmul.f32 %v272_v31, %v547_v2  ;;  %v143_v5 = vmul.f32 %v274_v38, %v117_v10 }
  0x57   :  { %230 = vst [vmem:[#allocation10] sm:$0xf] %v220_v60  ;;  %v145_v7 = vmul.f32 %v276_v39, %v551_v9  ;;  %v183_v8 = vmul.f32 %v278_v40, %v157_v17  ;;  %v185_v11 = vmul.f32 %v280_v44, %v155_v16  ;;  %v188_v12 = vadd.f32 %v186_v0, %v148_v55  ;;  %p388_p7 = por %p387_p6, %p386_p5 }
  0x58   :  { %v181_v6 = vadd.f32 %v179_v56, %v141_v61  ;;  %v109_v13 = vadd.f32 %v107_v4, %v105_v63  ;;  %v223_v14 = vmul.f32 %v282_v46, %v197_v28  ;;  %v225_v15 = vmul.f32 %v284_v47, %v195_v25 }
  0x59   :  { %v147_v19 = vadd.f32 %v145_v7, %v143_v5  ;;  %v187_v3 = vadd.f32 %v185_v11, %v183_v8  ;;  %v228_v20 = vadd.f32 %v226_v1, %v188_v12  ;;  %p389_p8 = pnand %p388_p7, %p382_p4 }
  0x5a   :  { %v221_v18 = vadd.f32 %v219_v62, %v181_v6  ;;  %v227_v10 = vadd.f32 %v225_v15, %v223_v14 }
  0x5b   :  { %v149_v2 = vadd.f32 %v147_v19, %v109_v13  ;;  %232 = vst [vmem:[#allocation11] sm:$0xf] %v228_v20 }
  0x5c   :  { %231 = vst [vmem:[#allocation10 + $0x4] sm:$0xf] %v221_v18 }
  0x5d   :  { %392 = shalt.err (!%p389_p8)
}
  0x5e   :  { %s393_s23 = scalar_lea.hbm %s593_s4, 128 }
  0x5f   :  { %p394_p9 = scmp.ne.s32.totalorder %s593_s4, %s393_s23  ;;  %p397_p10 = scmp.lt.u32.totalorder %s393_s23, %s593_s4 }
  0x61   :  { %p399_p11 = pnand %p397_p10, %p394_p9 }
  0x63   :  { %402 = shalt.err (!%p399_p11)
}
  0x64   :  { %245 = dma.vmem_to_hbm [thread:$0]  %s240_s1, 128, %s593_s4, [#allocation4], %s437_s30, %s437_s30, %s438_s6   ;;  %v189_v9 = vadd.f32 %v187_v3, %v149_v2 }
  0x65   :  { %s403_s0 = scalar_lea.vmem %s252_s18, 128  ;;  %p408_p13 = scmp.lt.s32.totalorder %s252_s18, %s252_s18 }
  0x66   :  { %v229_v16 = vadd.f32 %v227_v10, %v189_v9  ;;  %p404_p12 = scmp.ne.s32.totalorder %s252_s18, %s403_s0  ;;  %p409_p0 = scmp.lt.s32.totalorder %s403_s0, %s403_s0 }
  0x68   :  { %233 = vst [vmem:[#allocation11 + $0x4] sm:$0xf] %v229_v16  ;;  %p410_p1 = por %p409_p0, %p408_p13 }
  0x6a   :  { %p411_p2 = pnand %p410_p1, %p404_p12 }
  0x6c   :  { %414 = shalt.err (!%p411_p2)
}
  0x6d   :  { %s415_s8 = scalar_lea.hbm %s594_s5, 128 }
  0x6e   :  { %p416_p3 = scmp.ne.s32.totalorder %s594_s5, %s415_s8  ;;  %p419_p4 = scmp.lt.u32.totalorder %s415_s8, %s594_s5 }
  0x70   :  { %p421_p5 = pnand %p419_p4, %p416_p3 }
  0x72   :  { %424 = shalt.err (!%p421_p5)
}
  0x73   :  { %257 = dma.vmem_to_hbm [thread:$0]  %s252_s18, 128, %s594_s5, [#allocation12], %s437_s30, %s437_s30, %s438_s6  }
  0x74   :  { %431 = dma.done.wait [#allocation4], 128  }
  0x75   :  { %432 = vsyncadd [#allocation4], 4294967168 }
  0x76   :  { %433 = dma.done.wait [#allocation12], 128  }
  0x77   :  { %434 = vsyncadd [#allocation12], 4294967168 }
  0x78   :  { %264 = vsyncpa [#allocation3], 1 }
  0x79   :  { %265 = vsyncpa [#allocation6], 1 }
  0x7a   :  { %266 = vsyncpa [#allocation9], 1 }
  0x7b   :  { %267 = vsyncpa [#allocation4], 1 }
  0x7c   :  { %268 = vsyncpa [#allocation12], 1 }

</bundles_post_ra>
